<compile_context>
chip_gen: v7x
topology: tpu7x:2x2x1
jax: 0.10.0
libtpu: 0.0.40
codegen_flags: <defaults>
</compile_context>

<pallas_src>
import functools
import math

import numpy as np
import jax
import jax.numpy as jnp
from jax import lax
from jax.experimental import pallas as pl
from jax.experimental.pallas import tpu as pltpu


def _round_up(a, b):
    return ((a + b - 1) // b) * b


def pe_kernel(x_ref, mult_ref, o_ref, *, tr, group, size, width):
    # x_ref:    (tr, group)  f32  -- `group` scalar positions per output row
    # mult_ref: (1, width)   f32  -- interleaved multiplier tiled `group` times
    # o_ref:    (tr, width)  f32  -- lane-dense output row (width = group*size)
    x = x_ref[...]                                    # (tr, group)
    m = mult_ref[...]                                 # (1, width)

    lane = lax.broadcasted_iota(jnp.int32, (1, width), 1)

    # Fan out column j of x into lanes [j*size, (j+1)*size): lane-broadcast each
    # column and overwrite with a running select (only >= compares, no div/reshape).
    xe = jnp.broadcast_to(x[:, 0:1], (tr, width))
    for j in range(1, group):
        bj = jnp.broadcast_to(x[:, j:j + 1], (tr, width))
        xe = jnp.where(lane >= j * size, bj, xe)

    t = xe * m                                        # (tr, width)

    # Interleaving is [sin, cos, sin, cos, ...]; since `size` is even, the parity
    # of (lane % size) equals lane % 2.
    even = (lane % 2) == 0                            # (1, width) bool
    o_ref[...] = jnp.where(even, jnp.sin(t), jnp.cos(t)).astype(jnp.float32)


def _make_mult_lane(phases, freq_min, freq_max, group):
    # Match the PyTorch buffer values (computed in f64, then cast to f32).
    ls = np.linspace(0.0, 1.0, phases)
    mult = np.exp(ls * np.log(freq_max) + (1.0 - ls) * np.log(freq_min)) * (2.0 * np.pi)
    inter = np.repeat(mult, 2)                        # (size,) [m0,m0,m1,m1,...]
    lane_vec = np.tile(inter, group)                  # (group*size,)
    return jnp.asarray(lane_vec, dtype=jnp.float32).reshape(1, group * size_of(phases))


def size_of(phases):
    return 2 * phases


def positional_encoding(x, phases, freq_min=1, freq_max=10000, block_rows=None):
    size = 2 * phases
    orig_shape = x.shape
    n = math.prod(orig_shape)

    # Group consecutive positions into one lane-dense output row.
    if size % 128 == 0:
        group = 1                      # already lane-aligned
    elif 128 % size == 0:
        group = 128 // size            # e.g. phases=16 -> size=32 -> group=4
    else:
        group = 1                      # fallback: width=size (possibly masked)
    width = group * size

    x_flat = jnp.asarray(x, jnp.float32).reshape(-1)
    rows = -(-n // group)

    # ~4 MiB f32 output tile (double-buffered ~8 MiB < default scoped VMEM on
    # v5e/v6e/v7x), rows multiple of 8 for the (8,128) tiling rule.
    if block_rows is None:
        block_rows = max(8, ((4 * 1024 * 1024) // (width * 4)) // 8 * 8)
    tr = _round_up(min(block_rows, _round_up(rows, 8)), 8)
    rows_pad = _round_up(rows, tr)

    pad = rows_pad * group - n
    if pad:
        x_flat = jnp.pad(x_flat, (0, pad))
    x2d = x_flat.reshape(rows_pad, group)

    mult_lane = _make_mult_lane(phases, freq_min, freq_max, group)   # (1, width)

    kernel = functools.partial(pe_kernel, tr=tr, group=group, size=size, width=width)
    out2d = pl.pallas_call(
        kernel,
        out_shape=jax.ShapeDtypeStruct((rows_pad, width), jnp.float32),
        grid=(rows_pad // tr,),
        in_specs=[
            pl.BlockSpec((tr, group), lambda i: (i, 0)),
            pl.BlockSpec((1, width), lambda i: (0, 0)),
        ],
        out_specs=pl.BlockSpec((tr, width), lambda i: (i, 0)),
        compiler_params=pltpu.CompilerParams(
            dimension_semantics=("parallel",),
            vmem_limit_bytes=32 * 1024 * 1024,
        ),
    )(x2d, mult_lane)

    # (rows_pad, width) flattened row-major is exactly (..., size) flattened.
    out_flat = out2d.reshape(-1)
    if pad:
        out_flat = out_flat[: n * size]
    return out_flat.reshape(*orig_shape, size)


def positional_encoding_ref(x, phases, freq_min=1, freq_max=10000):
    # Pure-JAX (f32) reference mirroring the PyTorch forward.
    ls = np.linspace(0.0, 1.0, phases)
    mult = jnp.asarray(
        np.exp(ls * np.log(freq_max) + (1.0 - ls) * np.log(freq_min)) * (2.0 * np.pi),
        dtype=jnp.float32)
    t = jnp.asarray(x, jnp.float32)[..., None] * mult
    t = jnp.stack([jnp.sin(t), jnp.cos(t)], axis=-1)
    return t.reshape(*t.shape[:-2], 2 * phases).astype(jnp.float32)


if __name__ == "__main__":
    phases = 16                       # -> encoding size 32
    key = jax.random.PRNGKey(0)
    k1, k2, k3 = jax.random.split(key, 3)

    # 1) basic case (exact lane-group fit, grid = 1)
    x1 = jax.random.uniform(k1, (2, 4, 16), dtype=jnp.float32) * 10.0
    out1 = jax.block_until_ready(positional_encoding(x1, phases))
    ref1 = positional_encoding_ref(x1, phases)
    assert out1.shape == (2, 4, 16, 2 * phases), out1.shape
    assert out1.dtype == jnp.float32
    np.testing.assert_allclose(np.asarray(out1), np.asarray(ref1), rtol=1e-5, atol=1e-5)

    # 2) padding path (element count not a multiple of the lane group)
    x2 = jax.random.uniform(k2, (3, 5, 7), dtype=jnp.float32) * 10.0
    out2 = jax.block_until_ready(positional_encoding(x2, phases))
    np.testing.assert_allclose(np.asarray(out2),
                               np.asarray(positional_encoding_ref(x2, phases)),
                               rtol=1e-5, atol=1e-5)

    # 3) multi-tile grid / pipelining path (small block_rows override -> grid=4)
    x3 = jax.random.uniform(k3, (4, 8, 16), dtype=jnp.float32) * 10.0 - 5.0
    out3 = jax.block_until_ready(positional_encoding(x3, phases, block_rows=32))
    np.testing.assert_allclose(np.asarray(out3),
                               np.asarray(positional_encoding_ref(x3, phases)),
                               rtol=1e-5, atol=1e-5)

    print("KERNEL_OK")
</pallas_src>

<mosaic_0001>
module attributes {stable_mosaic.version = 11 : i64} {
  func.func @pe_kernel(%arg0: i32, %arg1: memref<32x4xf32, #tpu.memory_space<vmem>>, %arg2: memref<1x128xf32, #tpu.memory_space<vmem>>, %arg3: memref<32x128xf32, #tpu.memory_space<vmem>>) attributes {dimension_semantics = [#tpu.dimension_semantics<parallel>], iteration_bounds = array<i64: 1>, scalar_prefetch = 0 : i64, scratch_operands = 0 : i64, tpu.core_type = #tpu.core_type<tc>, window_params = [{transform_indices = @transform_0, window_bounds = array<i64: 32, 4>}, {pipeline_mode = #tpu.pipeline_mode<synchronous>, transform_indices = @transform_1, window_bounds = array<i64: 1, 128>}, {transform_indices = @transform_2, window_bounds = array<i64: 32, 128>}]} {
    %c0 = arith.constant 0 : index
    %c0_0 = arith.constant 0 : index
    %0 = vector.load %arg1[%c0, %c0_0] : memref<32x4xf32, #tpu.memory_space<vmem>>, vector<32x4xf32>
    %c0_1 = arith.constant 0 : index
    %c0_2 = arith.constant 0 : index
    %1 = vector.load %arg2[%c0_1, %c0_2] : memref<1x128xf32, #tpu.memory_space<vmem>>, vector<1x128xf32>
    %2 = tpu.iota {dimensions = array<i32: 1>} : vector<1x128xi32>
    %3 = vector.extract_strided_slice %0 {offsets = [0, 0], sizes = [32, 1], strides = [1, 1]} : vector<32x4xf32> to vector<32x1xf32>
    %4 = vector.shape_cast %3 : vector<32x1xf32> to vector<32x1xf32>
    %5 = vector.broadcast %4 : vector<32x1xf32> to vector<32x128xf32>
    %6 = vector.extract_strided_slice %0 {offsets = [0, 1], sizes = [32, 1], strides = [1, 1]} : vector<32x4xf32> to vector<32x1xf32>
    %7 = vector.shape_cast %6 : vector<32x1xf32> to vector<32x1xf32>
    %8 = vector.broadcast %7 : vector<32x1xf32> to vector<32x128xf32>
    %c32_i32 = arith.constant 32 : i32
    %9 = vector.broadcast %c32_i32 : i32 to vector<1x128xi32>
    %10 = arith.cmpi sge, %2, %9 : vector<1x128xi32>
    %11 = vector.shape_cast %10 : vector<1x128xi1> to vector<1x128xi1>
    %12 = vector.broadcast %11 : vector<1x128xi1> to vector<32x128xi1>
    %13 = arith.select %12, %8, %5 : vector<32x128xi1>, vector<32x128xf32>
    %14 = vector.extract_strided_slice %0 {offsets = [0, 2], sizes = [32, 1], strides = [1, 1]} : vector<32x4xf32> to vector<32x1xf32>
    %15 = vector.shape_cast %14 : vector<32x1xf32> to vector<32x1xf32>
    %16 = vector.broadcast %15 : vector<32x1xf32> to vector<32x128xf32>
    %c64_i32 = arith.constant 64 : i32
    %17 = vector.broadcast %c64_i32 : i32 to vector<1x128xi32>
    %18 = arith.cmpi sge, %2, %17 : vector<1x128xi32>
    %19 = vector.shape_cast %18 : vector<1x128xi1> to vector<1x128xi1>
    %20 = vector.broadcast %19 : vector<1x128xi1> to vector<32x128xi1>
    %21 = arith.select %20, %16, %13 : vector<32x128xi1>, vector<32x128xf32>
    %22 = vector.extract_strided_slice %0 {offsets = [0, 3], sizes = [32, 1], strides = [1, 1]} : vector<32x4xf32> to vector<32x1xf32>
    %23 = vector.shape_cast %22 : vector<32x1xf32> to vector<32x1xf32>
    %24 = vector.broadcast %23 : vector<32x1xf32> to vector<32x128xf32>
    %c96_i32 = arith.constant 96 : i32
    %25 = vector.broadcast %c96_i32 : i32 to vector<1x128xi32>
    %26 = arith.cmpi sge, %2, %25 : vector<1x128xi32>
    %27 = vector.shape_cast %26 : vector<1x128xi1> to vector<1x128xi1>
    %28 = vector.broadcast %27 : vector<1x128xi1> to vector<32x128xi1>
    %29 = arith.select %28, %24, %21 : vector<32x128xi1>, vector<32x128xf32>
    %30 = vector.broadcast %1 : vector<1x128xf32> to vector<32x128xf32>
    %31 = arith.mulf %29, %30 : vector<32x128xf32>
    %c2_i32 = arith.constant 2 : i32
    %c0_i32 = arith.constant 0 : i32
    %32 = arith.cmpi eq, %c2_i32, %c0_i32 : i32
    %c1_i32 = arith.constant 1 : i32
    %33 = arith.select %32, %c1_i32, %c2_i32 : i32
    %34 = vector.broadcast %33 : i32 to vector<1x128xi32>
    %35 = arith.remsi %2, %34 : vector<1x128xi32>
    %c0_i32_3 = arith.constant 0 : i32
    %36 = vector.broadcast %c0_i32_3 : i32 to vector<1x128xi32>
    %37 = arith.cmpi ne, %35, %36 : vector<1x128xi32>
    %c0_i32_4 = arith.constant 0 : i32
    %38 = vector.broadcast %c0_i32_4 : i32 to vector<1x128xi32>
    %39 = arith.cmpi slt, %35, %38 : vector<1x128xi32>
    %c0_i32_5 = arith.constant 0 : i32
    %40 = arith.cmpi slt, %33, %c0_i32_5 : i32
    %41 = vector.broadcast %40 : i1 to vector<1x128xi1>
    %42 = vector.broadcast %41 : vector<1x128xi1> to vector<1x128xi1>
    %43 = arith.xori %39, %42 : vector<1x128xi1>
    %44 = arith.andi %43, %37 : vector<1x128xi1>
    %45 = vector.broadcast %33 : i32 to vector<1x128xi32>
    %46 = arith.addi %35, %45 : vector<1x128xi32>
    %47 = arith.select %44, %46, %35 : vector<1x128xi1>, vector<1x128xi32>
    %c0_i32_6 = arith.constant 0 : i32
    %48 = vector.broadcast %c0_i32_6 : i32 to vector<1x128xi32>
    %49 = arith.cmpi eq, %47, %48 : vector<1x128xi32>
    %50 = math.sin %31 : vector<32x128xf32>
    %51 = math.cos %31 : vector<32x128xf32>
    %52 = vector.shape_cast %49 : vector<1x128xi1> to vector<1x128xi1>
    %53 = vector.broadcast %52 : vector<1x128xi1> to vector<32x128xi1>
    %54 = arith.select %53, %50, %51 : vector<32x128xi1>, vector<32x128xf32>
    %c0_7 = arith.constant 0 : index
    %c0_8 = arith.constant 0 : index
    %55 = vector.load %arg3[%c0_7, %c0_8] : memref<32x128xf32, #tpu.memory_space<vmem>>, vector<32x128xf32>
    tpu.vector_store %arg3[%c0_7, %c0_8], %54 {strides = array<i32>} : memref<32x128xf32, #tpu.memory_space<vmem>>, vector<32x128xf32>,
    return
  }
  func.func @transform_0(%arg0: i32) -> (i32, i32) {
    %c0_i32 = arith.constant 0 : i32
    %c0_i32_0 = arith.constant 0 : i32
    return %arg0, %c0_i32 : i32, i32
  }
  func.func @transform_1(%arg0: i32) -> (i32, i32) {
    %c0_i32 = arith.constant 0 : i32
    %c0_i32_0 = arith.constant 0 : i32
    %c0_i32_1 = arith.constant 0 : i32
    return %c0_i32, %c0_i32_0 : i32, i32
  }
  func.func @transform_2(%arg0: i32) -> (i32, i32) {
    %c0_i32 = arith.constant 0 : i32
    %c0_i32_0 = arith.constant 0 : i32
    return %arg0, %c0_i32 : i32, i32
  }
}

</mosaic_0001>

<bundles_post_ra>
// kernel: tpu_custom_call.1
= control target key start
LH: loop header
LB: loop body
LE: loop exit
PB: predicated region body
PF: predicated region fallthrough
CT: control target
= control target key end

     0   :  { %v1095_v2 = vmov 0   ;;  %s1494_s0 = inlined_call_operand.vmem [shape: f32[32,4], index: 0, kind: input, shape index: {}]   ;;  %s1495_s1 = inlined_call_operand.vmem [shape: f32[1,128], index: 1, kind: input, shape index: {}]   ;;  %s1496_s2 = inlined_call_operand.hbm [shape: f32[32,128], index: 2, kind: output, shape index: {}]  }
   0x1   :  { %v14_v0 = vld [vmem:[%s1494_s0 + $0x10] sm:$0xff]  ;;  %v12_v1 = vld [vmem:[%s1494_s0] sm:$0xff]  ;;  %1048 = vset.pattern.permute.xlu1 %v1095_v2  ;;  %1047 = vset.pattern.permute.xlu0 %v1095_v2 }
   0x2   :  { %7 = vsyncpa [#allocation3], 0  ;;  %31 = vperm.xlu1 %1048, %v14_v0   ;;  %21 = vperm.xlu0 %1047, %v12_v1   ;;  %v15_v3 = vld [vmem:[%s1494_s0 + $0x18] sm:$0xff]  ;;  %v13_v4 = vld [vmem:[%s1494_s0 + $0x8] sm:$0xff]  ;;  %v1096_v5 = vmov 1   ;;  %v1097_v6 = vmov 2   ;;  %v17_v12 = vlaneseq }
   0x3   :  { %v1098_v7 = vmov 3   ;;  %v1151_v23 = vld [vmem:[%s1495_s1] ss:$0 sm:$0xff]  ;;  %v1099_v58 = vmov 683565275   ;;  %s1105_s1 = smov [#allocation2]  }
   0x4   :  { %v1135_v13 = vand.u32 127, %v17_v12  ;;  %v1100_v60 = vmov 2475754826   ;;  %v1101_v63 = vmov 2131351028   ;;  %s974_s18 = sshll.u32 %s1105_s1, 4  ;;  %s975_s18 = int_to_ptr.vmem [resolvable:$true] %s974_s18 }
   0x5   :  { %s1071_s19 = scalar_lea.vmem %s975_s18, 512  ;;  %p1076_p1 = scmp.lt.s32.totalorder %s975_s18, %s975_s18 }
   0x6   :  { %36 = vperm.xlu1 %1048, %v15_v3   ;;  %26 = vperm.xlu0 %1047, %v13_v4   ;;  %vm55_vm0 = vcmp.ge.s32.totalorder %v1135_v13, 32  ;;  %vm78_vm1 = vcmp.ge.s32.totalorder %v1135_v13, 64  ;;  %vm101_vm2 = vcmp.ge.s32.totalorder %v1135_v13, 96  ;;  %p1072_p0 = scmp.ne.s32.totalorder %s975_s18, %s1071_s19  ;;  %p1077_p2 = scmp.lt.s32.totalorder %s1071_s19, %s1071_s19 }
   0x8   :  { %p1078_p3 = por %p1077_p2, %p1076_p1 }
   0xa   :  { %1050 = vset.pattern.permute.xlu1 %v1096_v5  ;;  %1049 = vset.pattern.permute.xlu0 %v1096_v5  ;;  %p1079_p4 = pnand %p1078_p3, %p1072_p0 }
   0xb   :  { %44 = vperm.xlu1 %1050, %v13_v4   ;;  %40 = vperm.xlu0 %1049, %v12_v1  }
   0xf   :  { %48 = vperm.xlu1 %1050, %v14_v0   ;;  %52 = vperm.xlu0 %1049, %v15_v3  }
  0x13   :  { %1051 = vset.pattern.permute.xlu1 %v1097_v6  ;;  %1052 = vset.pattern.permute.xlu0 %v1097_v6 }
  0x14   :  { %63 = vperm.xlu1 %1051, %v12_v1   ;;  %67 = vperm.xlu0 %1052, %v13_v4  }
  0x18   :  { %71 = vperm.xlu1 %1051, %v14_v0   ;;  %1053 = vset.pattern.permute.xlu0 %v1098_v7 }
  0x19   :  { %86 = vperm.xlu0 %1053, %v12_v1   ;;  %v1102_v1 = vmov 2102212464  }
  0x1c   :  { %75 = vperm.xlu1 %1051, %v15_v3  }
  0x1d   :  { %98 = vperm.xlu0 %1053, %v15_v3   ;;  %v1103_v3 = vmov 920167782  }
  0x20   :  { %1054 = vset.pattern.permute.xlu1 %v1098_v7 }
  0x21   :  { %90 = vperm.xlu1 %1054, %v13_v4  }
  0x25   :  { %94 = vperm.xlu1 %1054, %v14_v0  }
  0x81   :  { %v32_v8 = vpop.permute.xlu1 %31  ;;  %v22_v9 = vpop.permute.xlu0 %21 }
  0x85   :  { %v37_v10 = vpop.permute.xlu1 %36  ;;  %v27_v11 = vpop.permute.xlu0 %26 }
  0x8a   :  { %v45_v14 = vpop.permute.xlu1 %44  ;;  %v41_v15 = vpop.permute.xlu0 %40 }
  0x8b   :  { %v58_v21 = vsel %vm55_vm0, %v41_v15, %v22_v9  ;;  %v59_v38 = vsel %vm55_vm0, %v45_v14, %v27_v11 }
  0x8e   :  { %v49_v16 = vpop.permute.xlu1 %48  ;;  %v53_v17 = vpop.permute.xlu0 %52 }
  0x8f   :  { %v1140_v18 = vsel %vm55_vm0, %v49_v16, %v32_v8  ;;  %v61_v29 = vsel %vm55_vm0, %v53_v17, %v37_v10  ;;  %v1104_v10 = vmov 1326507024  }
  0x93   :  { %v64_v19 = vpop.permute.xlu1 %63  ;;  %v68_v20 = vpop.permute.xlu0 %67 }
  0x94   :  { %v81_v24 = vsel %vm78_vm1, %v64_v19, %v58_v21  ;;  %v82_v41 = vsel %vm78_vm1, %v68_v20, %v59_v38 }
  0x97   :  { %v1146_v22 = vpop.permute.xlu1 %71 }
  0x98   :  { %v87_v25 = vpop.permute.xlu0 %86 }
  0x99   :  { %v104_v26 = vsel %vm101_vm2, %v87_v25, %v81_v24 }
  0x9a   :  { %v1158_v27 = vmul.f32 %v1151_v23, %v104_v26 }
  0x9b   :  { %v76_v28 = vpop.permute.xlu1 %75 }
  0x9c   :  { %v131_v30 = vand.u32 2147483647, %v1158_v27  ;;  %v134_v31 = vand.u32 2139095040, %v1158_v27  ;;  %v99_v32 = vpop.permute.xlu0 %98  ;;  %v84_v33 = vsel %vm78_vm1, %v76_v28, %v61_v29  ;;  %vm133_vm0 = vcmp.lt.s32.totalorder %v1158_v27, 0 }
  0x9d   :  { %v107_v35 = vsel %vm101_vm2, %v99_v32, %v84_v33 }
  0x9e   :  { %v135_v34 = vshrl.u32 %v134_v31, 23  ;;  %v138_v36 = vand.u32 8388607, %v131_v30  ;;  %v1171_v37 = vmul.f32 %v1151_v23, %v107_v35 }
  0xa0   :  { %v986_v39 = vadd.s32 4294967169, %v135_v34  ;;  %v91_v40 = vpop.permute.xlu1 %90  ;;  %v443_v42 = vand.u32 2147483647, %v1171_v37  ;;  %v446_v43 = vand.u32 2139095040, %v1171_v37  ;;  %v139_v46 = vor.u32 8388608, %v138_v36 }
  0xa1   :  { %v105_v45 = vsel %vm101_vm2, %v91_v40, %v82_v41 }
  0xa2   :  { %v141_v44 = vadd.s32 1, %v986_v39  ;;  %v447_v47 = vshrl.u32 %v446_v43, 23  ;;  %v450_v48 = vand.u32 8388607, %v443_v42  ;;  %v1184_v49 = vmul.f32 %v1151_v23, %v105_v45 }
  0xa3   :  { %v1186_v54 = vshll.u32 %v139_v46, 8 }
  0xa4   :  { %vm142_vm3 = vcmp.gt.s32.totalorder %v141_v44, 0  ;;  %v998_v51 = vadd.s32 4294967169, %v447_v47  ;;  %v451_v55 = vor.u32 8388608, %v450_v48  ;;  %v238_v56 = vand.u32 2139095040, %v1184_v49 }
  0xa5   :  { %v143_v50 = vsel %vm142_vm3, %v141_v44, 0 }
  0xa6   :  { %v144_v52 = vshrl.u32 %v143_v50, 5  ;;  %v145_v53 = vand.u32 31, %v143_v50  ;;  %v453_v62 = vadd.s32 1, %v998_v51  ;;  %v491_v46 = vshll.u32 %v451_v55, 8 }
  0xa7   :  { %v239_v47 = vshrl.u32 %v238_v56, 23 }
  0xa8   :  { %v146_v57 = vsub.s32 32, %v145_v53  ;;  %v148_v59 = vshll.u32 %v1099_v58, %v145_v53  ;;  %v151_v61 = vshll.u32 %v1100_v60, %v145_v53  ;;  %v154_v0 = vshll.u32 %v1101_v63, %v145_v53 }
  0xa9   :  { %v157_v2 = vshll.u32 %v1102_v1, %v145_v53  ;;  %v160_v4 = vshll.u32 %v1103_v3, %v145_v53  ;;  %vm163_vm4 = vcmp.lt.s32.totalorder %v144_v52, 1  ;;  %vm164_vm5 = vcmp.lt.s32.totalorder %v144_v52, 2 }
  0xaa   :  { %v149_v5 = vshrl.u32 %v1100_v60, %v146_v57  ;;  %v152_v6 = vshrl.u32 %v1101_v63, %v146_v57  ;;  %v155_v7 = vshrl.u32 %v1102_v1, %v146_v57  ;;  %v147_v8 = vshrl.u32 %v1099_v58, %v146_v57 }
  0xab   :  { %v158_v9 = vshrl.u32 %v1103_v3, %v146_v57  ;;  %v161_v11 = vshrl.u32 %v1104_v10, %v146_v57  ;;  %vm165_vm6 = vcmp.lt.s32.totalorder %v144_v52, 3  ;;  %vm454_vm7 = vcmp.gt.s32.totalorder %v453_v62, 0 }
  0xac   :  { %v150_v12 = vor.u32 %v149_v5, %v148_v59  ;;  %v153_v14 = vor.u32 %v152_v6, %v151_v61  ;;  %v156_v15 = vor.u32 %v155_v7, %v154_v0  ;;  %vm166_vm8 = vcmp.lt.s32.totalorder %v144_v52, 4 }
  0xad   :  { %v159_v16 = vor.u32 %v158_v9, %v157_v2  ;;  %v162_v17 = vor.u32 %v161_v11, %v160_v4  ;;  %v455_v19 = vsel %vm454_vm7, %v453_v62, 0 }
  0xae   :  { %v167_v20 = vsel %vm163_vm4, %v147_v8, %v150_v12  ;;  %v168_v21 = vsel %vm166_vm8, %v156_v15, 2102212464  ;;  %v171_v24 = vsel %vm163_vm4, %v150_v12, %v153_v14  ;;  %v175_v25 = vsel %vm163_vm4, %v153_v14, %v156_v15 }
  0xaf   :  { %v169_v26 = vsel %vm165_vm6, %v153_v14, %v168_v21  ;;  %v172_v28 = vsel %vm166_vm8, %v159_v16, 920167782  ;;  %v176_v29 = vsel %vm166_vm8, %v162_v17, 1326507024  ;;  %v456_v31 = vshrl.u32 %v455_v19, 5 }
  0xb0   :  { %v170_v32 = vsel %vm164_vm5, %v167_v20, %v169_v26  ;;  %v173_v33 = vsel %vm165_vm6, %v156_v15, %v172_v28  ;;  %v177_v34 = vsel %vm165_vm6, %v159_v16, %v176_v29  ;;  %v457_v35 = vand.u32 31, %v455_v19 }
  0xb1   :  { %v174_v36 = vsel %vm164_vm5, %v171_v24, %v173_v33  ;;  %v178_v38 = vsel %vm164_vm5, %v175_v25, %v177_v34  ;;  %v186_v44 = vmul.u32 %v1186_v54, %v170_v32  ;;  %vm475_vm9 = vcmp.lt.s32.totalorder %v456_v31, 1 }
  0xb2   :  { %v1210_v39 = vmul.u32.u64.low %v1186_v54, %v178_v38  ;;  %v1211_v40 = vmul.u32.u64.high %v1186_v54, %v178_v38, %v1210_v39  ;;  %v1214_v41 = vmul.u32.u64.low %v1186_v54, %v174_v36  ;;  %v1215_v43 = vmul.u32.u64.high %v1186_v54, %v174_v36, %v1214_v41 }
  0xb3   :  { %v458_v45 = vsub.s32 32, %v457_v35  ;;  %v460_v48 = vshll.u32 %v1099_v58, %v457_v35  ;;  %v463_v50 = vshll.u32 %v1100_v60, %v457_v35  ;;  %v466_v51 = vshll.u32 %v1101_v63, %v457_v35 }
  0xb4   :  { %v469_v59 = vshll.u32 %v1102_v1, %v457_v35  ;;  %vm188_vm10 = vc.u32 %v1211_v40, %v1214_v41  ;;  %v189_v54 = vadd.s32 1, %v1215_v43  ;;  %v472_v56 = vshll.u32 %v1103_v3, %v457_v35 }
  0xb5   :  { %v461_v52 = vshrl.u32 %v1100_v60, %v458_v45  ;;  %v464_v53 = vshrl.u32 %v1101_v63, %v458_v45  ;;  %v467_v57 = vshrl.u32 %v1102_v1, %v458_v45  ;;  %v470_v55 = vshrl.u32 %v1103_v3, %v458_v45 }
  0xb6   :  { %v473_v2 = vshrl.u32 %v1104_v10, %v458_v45  ;;  %v190_v4 = vsel %vm188_vm10, %v189_v54, %v1215_v43  ;;  %vm477_vm11 = vcmp.lt.s32.totalorder %v456_v31, 3  ;;  %vm478_vm12 = vcmp.lt.s32.totalorder %v456_v31, 4 }
  0xb7   :  { %v462_v61 = vor.u32 %v461_v52, %v460_v48  ;;  %v465_v62 = vor.u32 %v464_v53, %v463_v50  ;;  %v468_v0 = vor.u32 %v467_v57, %v466_v51  ;;  %v471_v5 = vor.u32 %v470_v55, %v469_v59  ;;  %v95_v57 = vpop.permute.xlu1 %94 }
  0xb8   :  { %v191_v6 = vadd.s32 %v190_v4, %v186_v44  ;;  %v459_v7 = vshrl.u32 %v1099_v58, %v458_v45  ;;  %v474_v8 = vor.u32 %v473_v2, %v472_v56  ;;  %v990_v15 = vadd.s32 4294967169, %v239_v47 }
  0xb9   :  { %v480_v9 = vsel %vm478_vm12, %v468_v0, 2102212464  ;;  %v483_v11 = vsel %vm475_vm9, %v462_v61, %v465_v62  ;;  %v484_v12 = vsel %vm478_vm12, %v471_v5, 920167782  ;;  %v487_v14 = vsel %vm475_vm9, %v465_v62, %v468_v0 }
  0xba   :  { %v192_v16 = vadd.s32 536870912, %v191_v6  ;;  %vm476_vm13 = vcmp.lt.s32.totalorder %v456_v31, 2  ;;  %v485_v17 = vsel %vm477_vm11, %v468_v0, %v484_v12  ;;  %v488_v19 = vsel %vm478_vm12, %v474_v8, 1326507024 }
  0xbb   :  { %v479_v20 = vsel %vm475_vm9, %v459_v7, %v462_v61  ;;  %v481_v21 = vsel %vm477_vm11, %v465_v62, %v480_v9  ;;  %v486_v24 = vsel %vm476_vm13, %v483_v11, %v485_v17  ;;  %v489_v25 = vsel %vm477_vm11, %v471_v5, %v488_v19 }
  0xbc   :  { %v1240_v26 = vshrl.u32 %v192_v16, 30  ;;  %v490_v28 = vsel %vm476_vm13, %v487_v14, %v489_v25  ;;  %v1242_v29 = vmul.u32.u64.low %v491_v46, %v486_v24  ;;  %v1243_v32 = vmul.u32.u64.high %v491_v46, %v486_v24, %v1242_v29 }
  0xbd   :  { %v1246_v33 = vmul.u32.u64.low %v491_v46, %v490_v28  ;;  %v1247_v34 = vmul.u32.u64.high %v491_v46, %v490_v28, %v1246_v33  ;;  %v235_v35 = vand.u32 2147483647, %v1184_v49  ;;  %v245_v36 = vadd.s32 1, %v990_v15 }
  0xbe   :  { %v194_v38 = vshll.u32 %v1240_v26, 30  ;;  %v482_v39 = vsel %vm476_vm13, %v479_v20, %v481_v21  ;;  %v501_v31 = vadd.s32 1, %v1243_v32  ;;  %v187_v0 = vadd.s32 %v1214_v41, %v1211_v40 }
  0xbf   :  { %vm246_vm14 = vcmp.gt.s32.totalorder %v245_v36, 0  ;;  %v498_v45 = vmul.u32 %v491_v46, %v482_v39  ;;  %vm500_vm15 = vc.u32 %v1247_v34, %v1242_v29  ;;  %v242_v47 = vand.u32 8388607, %v235_v35 }
  0xc0   :  { %v195_v43 = vsub.s32 %v191_v6, %v194_v38  ;;  %v247_v44 = vsel %vm246_vm14, %v245_v36, 0  ;;  %v502_v50 = vsel %vm500_vm15, %v501_v31, %v1243_v32  ;;  %v83_v46 = vsel %vm78_vm1, %v1146_v22, %v1140_v18 }
  0xc1   :  { %v503_v51 = vadd.s32 %v502_v50, %v498_v45  ;;  %v249_v52 = vand.u32 31, %v247_v44  ;;  %v243_v54 = vor.u32 8388608, %v242_v47  ;;  %v106_v62 = vsel %vm101_vm2, %v95_v57, %v83_v46 }
  0xc2   :  { %v197_v48 = vsub.s32 0, %v195_v43  ;;  %v217_v4 = vsub.s32 4, %v1240_v26  ;;  %v1273_v18 = vshrl.u32 %v247_v44, 5  ;;  %v1277_v8 = vmul.f32 %v1151_v23, %v106_v62 }
  0xc3   :  { %v504_v59 = vadd.s32 536870912, %v503_v51  ;;  %v250_v55 = vsub.s32 32, %v249_v52  ;;  %v1271_v7 = vshll.u32 %v243_v54, 8  ;;  %v252_v22 = vshll.u32 %v1099_v58, %v249_v52 }
  0xc4   :  { %v987_v53 = vmin.u32 %v197_v48, %v195_v43  ;;  %v255_v15 = vshll.u32 %v1100_v60, %v249_v52  ;;  %v258_v20 = vshll.u32 %v1101_v63, %v249_v52  ;;  %v261_v23 = vshll.u32 %v1102_v1, %v249_v52 }
  0xc5   :  { %v1261_v61 = vshrl.u32 %v504_v59, 30  ;;  %v253_v6 = vshrl.u32 %v1100_v60, %v250_v55  ;;  %v256_v40 = vshrl.u32 %v1101_v63, %v250_v55  ;;  %v262_v41 = vshrl.u32 %v1103_v3, %v250_v55 }
  0xc6   :  { %v199_v56 = vclz %v987_v53  ;;  %v259_v16 = vshrl.u32 %v1102_v1, %v250_v55  ;;  %v265_v28 = vshrl.u32 %v1104_v10, %v250_v55  ;;  %v264_v38 = vshll.u32 %v1103_v3, %v249_v52 }
  0xc7   :  { %v506_v5 = vshll.u32 %v1261_v61, 30  ;;  %v254_v19 = vor.u32 %v253_v6, %v252_v22  ;;  %v257_v33 = vor.u32 %v256_v40, %v255_v15  ;;  %v263_v36 = vor.u32 %v262_v41, %v261_v23 }
  0xc8   :  { %v988_v2 = vadd.s32 4294967294, %v199_v56  ;;  %v218_v44 = vsel %vm133_vm0, %v217_v4, %v1240_v26  ;;  %v260_v45 = vor.u32 %v259_v16, %v258_v20  ;;  %vm1296_vm2 = vcmp.le.f32.partialorder %v131_v30, 0.7853982 }
  0xc9   :  { %v1279_v11 = vsub.s32 %v503_v51, %v506_v5  ;;  %v499_v47 = vadd.s32 %v1242_v29, %v1247_v34  ;;  %v266_v50 = vor.u32 %v265_v28, %v264_v38  ;;  %vm267_vm3 = vcmp.lt.s32.totalorder %v1273_v18, 1 }
  0xca   :  { %vm989_vm1 = vcmp.lt.s32.totalorder %v988_v2, 0  ;;  %v251_v52 = vshrl.u32 %v1099_v58, %v250_v55  ;;  %vm269_vm4 = vcmp.lt.s32.totalorder %v1273_v18, 3  ;;  %vm270_vm5 = vcmp.lt.s32.totalorder %v1273_v18, 4 }
  0xcb   :  { %v202_v9 = vsel %vm989_vm1, 0, %v988_v2  ;;  %v509_v17 = vsub.s32 0, %v1279_v11  ;;  %v275_v30 = vsel %vm267_vm3, %v254_v19, %v257_v33  ;;  %v276_v57 = vsel %vm270_vm5, %v263_v36, 920167782 }
  0xcc   :  { %v203_v12 = vsub.s32 32, %v202_v9  ;;  %v207_v14 = vsub.s32 4294967266, %v202_v9  ;;  %v204_v21 = vshll.u32 %v195_v43, %v202_v9  ;;  %v272_v54 = vsel %vm270_vm5, %v260_v45, 2102212464 }
  0xcd   :  { %v999_v32 = vmin.u32 %v509_v17, %v1279_v11  ;;  %v277_v29 = vsel %vm269_vm4, %v260_v45, %v276_v57  ;;  %v279_v34 = vsel %vm267_vm3, %v257_v33, %v260_v45  ;;  %vm268_vm7 = vcmp.lt.s32.totalorder %v1273_v18, 2 }
  0xce   :  { %v205_v24 = vshrl.u32 %v187_v0, %v203_v12  ;;  %v208_v25 = vadd.s32 127, %v207_v14  ;;  %v271_v46 = vsel %vm267_vm3, %v251_v52, %v254_v19  ;;  %v280_v56 = vsel %vm270_vm5, %v266_v50, 1326507024 }
  0xcf   :  { %v511_v48 = vclz %v999_v32  ;;  %v278_v0 = vsel %vm268_vm7, %v275_v30, %v277_v29  ;;  %v281_v2 = vsel %vm269_vm4, %v263_v36, %v280_v56  ;;  %v273_v6 = vsel %vm269_vm4, %v257_v33, %v272_v54 }
  0xd0   :  { %v206_v39 = vor.u32 %v205_v24, %v204_v21  ;;  %v209_v31 = vshll.u32 %v208_v25, 23  ;;  %v282_v22 = vsel %vm268_vm7, %v279_v34, %v281_v2  ;;  %v220_v20 = vsel %vm1296_vm2, 0, %v218_v44 }
  0xd1   :  { %v1000_v53 = vadd.s32 4294967294, %v511_v48  ;;  %v1319_v41 = vmul.u32.u64.low %v1271_v7, %v282_v22  ;;  %v1320_v12 = vmul.u32.u64.high %v1271_v7, %v282_v22, %v1319_v41  ;;  %v529_v23 = vsub.s32 4, %v1261_v61 }
  0xd2   :  { %v210_v51 = vor.u32 4788187, %v209_v31  ;;  %v213_v26 = vcvt.s32.f32 %v206_v39  ;;  %v1323_v16 = vmul.u32.u64.low %v1271_v7, %v278_v0  ;;  %v1324_v17 = vmul.u32.u64.high %v1271_v7, %v278_v0, %v1323_v16 }
  0xd3   :  { %vm1001_vm6 = vcmp.lt.s32.totalorder %v1000_v53, 0  ;;  %v274_v28 = vsel %vm268_vm7, %v271_v46, %v273_v6  ;;  %vm445_vm9 = vcmp.lt.s32.totalorder %v1171_v37, 0  ;;  %v224_v38 = vadd.s32 3, %v220_v20 }
  0xd4   :  { %v211_v59 = vand.u32 2147483647, %v210_v51  ;;  %v514_v62 = vsel %vm1001_vm6, 0, %v1000_v53  ;;  %vm292_vm8 = vc.u32 %v1320_v12, %v1323_v16  ;;  %v293_v36 = vadd.s32 1, %v1324_v17 }
  0xd5   :  { %v515_v4 = vsub.s32 32, %v514_v62  ;;  %v519_v5 = vsub.s32 4294967266, %v514_v62  ;;  %v516_v40 = vshll.u32 %v1279_v11, %v514_v62  ;;  %v342_v11 = vand.u32 2139095040, %v1277_v8 }
  0xd6   :  { %v214_v55 = vmul.f32 %v213_v26, %v211_v59  ;;  %v530_v39 = vsel %vm445_vm9, %v529_v23, %v1261_v61  ;;  %v290_v31 = vmul.u32 %v1271_v7, %v274_v28  ;;  %v294_v43 = vsel %vm292_vm8, %v293_v36, %v1324_v17 }
  0xd7   :  { %v517_v14 = vshrl.u32 %v499_v47, %v515_v4  ;;  %v520_v15 = vadd.s32 127, %v519_v5  ;;  %v343_v32 = vshrl.u32 %v342_v11, 23  ;;  %vm1349_vm10 = vcmp.le.f32.partialorder %v443_v42, 0.7853982 }
  0xd8   :  { %v215_v9 = vxor.u32 2147483648, %v214_v55  ;;  %v295_v48 = vadd.s32 %v294_v43, %v290_v31  ;;  %v640_v51 = vand.u32 3, %v220_v20  ;;  %v532_v61 = vsel %vm1349_vm10, 0, %v530_v39 }
  0xd9   :  { %v518_v24 = vor.u32 %v517_v14, %v516_v40  ;;  %v521_v25 = vshll.u32 %v520_v15, 23  ;;  %v994_v18 = vadd.s32 4294967169, %v343_v32  ;;  %v339_v7 = vand.u32 2147483647, %v1277_v8 }
  0xda   :  { %v216_v19 = vsel %vm133_vm0, %v215_v9, %v214_v55  ;;  %v225_v26 = vand.u32 3, %v224_v38  ;;  %v296_v53 = vadd.s32 536870912, %v295_v48  ;;  %v536_v59 = vadd.s32 3, %v532_v61 }
  0xdb   :  { %v219_v21 = vsel %vm1296_vm2, %v1158_v27, %v216_v19  ;;  %v522_v33 = vor.u32 4788187, %v521_v25  ;;  %v525_v45 = vcvt.s32.f32 %v518_v24  ;;  %v349_v50 = vadd.s32 1, %v994_v18 }
  0xdc   :  { %1055 = vcosq.f32 %v219_v21  ;;  %v1356_v54 = vshrl.u32 %v296_v53, 30  ;;  %vm642_vm12 = vcmp.eq.s32.totalorder %v640_v51, 0  ;;  %v346_v29 = vand.u32 8388607, %v339_v7 }
  0xdd   :  { %1057 = vsinq.f32 %v219_v21  ;;  %v523_v44 = vand.u32 2147483647, %v522_v33  ;;  %vm350_vm11 = vcmp.gt.s32.totalorder %v349_v50, 0  ;;  %vm227_vm13 = vcmp.eq.s32.totalorder %v225_v26, 0 }
  0xde   :  { %v351_v57 = vsel %vm350_vm11, %v349_v50, 0  ;;  %vm645_vm14 = vcmp.eq.s32.totalorder %v640_v51, 2  ;;  %v298_v55 = vshll.u32 %v1356_v54, 30  ;;  %vm230_vm15 = vcmp.eq.s32.totalorder %v225_v26, 2 }
  0xdf   :  { %v526_v52 = vmul.f32 %v525_v45, %v523_v44  ;;  %v353_v34 = vand.u32 31, %v351_v57  ;;  %v1366_v2 = vand.u32 3, %v532_v61  ;;  %v1368_v5 = vand.u32 3, %v536_v59 }
  0xe0   :  { %v1370_v6 = vsub.s32 %v295_v48, %v298_v55  ;;  %v347_v40 = vor.u32 8388608, %v346_v29  ;;  %vm223_vm0 = vweird.f32 %v1158_v27  ;;  %vm226_vm1 = vcmp.lt.s32.totalorder %v225_v26, 2 }
  0xe1   :  { %v527_v30 = vxor.u32 2147483648, %v526_v52  ;;  %v354_v41 = vsub.s32 32, %v353_v34  ;;  %vm641_vm2 = vcmp.lt.s32.totalorder %v640_v51, 2  ;;  %vm954_vm3 = vcmp.eq.s32.totalorder %v1366_v2, 2 }
  0xe2   :  { %v301_v17 = vsub.s32 0, %v1370_v6  ;;  %v122_v19 = vand.u32 1, %v1135_v13  ;;  %vm539_vm4 = vcmp.eq.s32.totalorder %v1368_v5, 0  ;;  %vm542_vm5 = vcmp.eq.s32.totalorder %v1368_v5, 2 }
  0xe3   :  { %v528_v42 = vsel %vm445_vm9, %v527_v30, %v526_v52  ;;  %vm951_vm6 = vcmp.eq.s32.totalorder %v1366_v2, 0  ;;  %vm538_vm7 = vcmp.lt.s32.totalorder %v1368_v5, 2  ;;  %vm950_vm8 = vcmp.lt.s32.totalorder %v1366_v2, 2 }
  0xe4   :  { %v531_v56 = vsel %vm1349_vm10, %v1171_v37, %v528_v42  ;;  %v991_v11 = vmin.u32 %v301_v17, %v1370_v6  ;;  %v291_v21 = vadd.s32 %v1323_v16, %v1320_v12  ;;  %v1386_v24 = vshrl.u32 %v351_v57, 5 }
  0xe5   :  { %1059 = vcosq.f32 %v531_v56  ;;  %v357_v13 = vshrl.u32 %v1100_v60, %v354_v41  ;;  %v1389_v25 = vshll.u32 %v347_v40, 8  ;;  %vm535_vm9 = vweird.f32 %v1171_v37 }
  0xe6   :  { %v1056_v46 = vpop.eup %1055  ;;  %1061 = vsinq.f32 %v531_v56  ;;  %v303_v28 = vclz %v991_v11  ;;  %v355_v32 = vshrl.u32 %v1099_v58, %v354_v41  ;;  %v356_v33 = vshll.u32 %v1099_v58, %v353_v34 }
  0xe7   :  { %v1058_v62 = vpop.eup %1057  ;;  %v231_v0 = vxor.u32 2147483648, %v1056_v46  ;;  %v359_v36 = vshll.u32 %v1100_v60, %v353_v34  ;;  %v360_v16 = vshrl.u32 %v1101_v63, %v354_v41  ;;  %v363_v39 = vshrl.u32 %v1102_v1, %v354_v41 }
  0xe8   :  { %v228_v4 = vxor.u32 2147483648, %v1058_v62  ;;  %v992_v31 = vadd.s32 4294967294, %v303_v28  ;;  %v362_v18 = vshll.u32 %v1101_v63, %v353_v34  ;;  %v366_v44 = vshrl.u32 %v1103_v3, %v354_v41 }
  0xe9   :  { %v232_v22 = vsel %vm230_vm15, %v231_v0, %v1058_v62  ;;  %v647_v9 = vsel %vm645_vm14, %v231_v0, %v1058_v62  ;;  %v369_v45 = vshrl.u32 %v1104_v10, %v354_v41  ;;  %v358_v43 = vor.u32 %v357_v13, %v356_v33 }
  0xea   :  { %v229_v14 = vsel %vm227_vm13, %v1056_v46, %v228_v4  ;;  %v644_v15 = vsel %vm642_vm12, %v1056_v46, %v228_v4  ;;  %v361_v60 = vor.u32 %v360_v16, %v359_v36  ;;  %v365_v47 = vshll.u32 %v1102_v1, %v353_v34 }
  0xeb   :  { %v233_v20 = vsel %vm226_vm1, %v229_v14, %v232_v22  ;;  %v648_v23 = vsel %vm641_vm2, %v644_v15, %v647_v9  ;;  %v368_v48 = vshll.u32 %v1103_v3, %v353_v34  ;;  %vm1406_vm10 = vcmp.eq.s32.totalorder %v122_v19, 0 }
  0xec   :  { %v234_v38 = vsel %vm223_vm0, nan, %v233_v20  ;;  %v649_v12 = vsel %vm223_vm0, nan, %v648_v23  ;;  %vm993_vm11 = vcmp.lt.s32.totalorder %v992_v31, 0  ;;  %v364_v52 = vor.u32 %v363_v39, %v362_v18 }
  0xed   :  { %vm371_vm12 = vcmp.lt.s32.totalorder %v1386_v24, 1  ;;  %v306_v61 = vsel %vm993_vm11, 0, %v992_v31  ;;  %v367_v10 = vor.u32 %v366_v44, %v365_v47  ;;  %vm372_vm13 = vcmp.lt.s32.totalorder %v1386_v24, 2 }
  0xee   :  { %v307_v26 = vsub.s32 32, %v306_v61  ;;  %v370_v53 = vor.u32 %v369_v45, %v368_v48  ;;  %v311_v59 = vsub.s32 4294967266, %v306_v61  ;;  %vm374_vm14 = vcmp.lt.s32.totalorder %v1386_v24, 4 }
  0xef   :  { %v1060_v58 = vpop.eup %1059  ;;  %v308_v34 = vshll.u32 %v1370_v6, %v306_v61  ;;  %vm373_vm15 = vcmp.lt.s32.totalorder %v1386_v24, 3  ;;  %v376_v62 = vsel %vm374_vm14, %v364_v52, 2102212464  ;;  %v379_v2 = vsel %vm371_vm12, %v358_v43, %v361_v60 }
  0xf0   :  { %v1062_v50 = vpop.eup %1061  ;;  %v543_v51 = vxor.u32 2147483648, %v1060_v58  ;;  %v309_v46 = vshrl.u32 %v291_v21, %v307_v26  ;;  %v312_v55 = vadd.s32 127, %v311_v59  ;;  %v380_v5 = vsel %vm374_vm14, %v367_v10, 920167782 }
  0xf1   :  { %v540_v63 = vxor.u32 2147483648, %v1062_v50  ;;  %v381_v22 = vsel %vm373_vm15, %v364_v52, %v380_v5  ;;  %v383_v9 = vsel %vm371_vm12, %v361_v60, %v364_v52  ;;  %v384_v40 = vsel %vm374_vm14, %v370_v53, 1326507024 }
  0xf2   :  { %v544_v1 = vsel %vm542_vm5, %v543_v51, %v1062_v50  ;;  %v956_v3 = vsel %vm954_vm3, %v543_v51, %v1062_v50  ;;  %v310_v4 = vor.u32 %v309_v46, %v308_v34  ;;  %v313_v6 = vshll.u32 %v312_v55, 23 }
  0xf3   :  { %v541_v30 = vsel %vm539_vm4, %v1060_v58, %v540_v63  ;;  %v953_v57 = vsel %vm951_vm6, %v1060_v58, %v540_v63  ;;  %v375_v41 = vsel %vm371_vm12, %v355_v32, %v358_v43  ;;  %v377_v37 = vsel %vm373_vm15, %v361_v60, %v376_v62 }
  0xf4   :  { %v545_v42 = vsel %vm538_vm7, %v541_v30, %v544_v1  ;;  %v957_v29 = vsel %vm950_vm8, %v953_v57, %v956_v3  ;;  %v382_v14 = vsel %vm372_vm13, %v379_v2, %v381_v22  ;;  %v385_v15 = vsel %vm373_vm15, %v367_v10, %v384_v40 }
  0xf5   :  { %v546_v56 = vsel %vm535_vm9, nan, %v545_v42  ;;  %v958_v0 = vsel %vm535_vm9, nan, %v957_v29  ;;  %v314_v17 = vor.u32 4788187, %v313_v6  ;;  %v386_v19 = vsel %vm372_vm13, %v383_v9, %v385_v15 }
  0xf6   :  { %v1448_v20 = vmul.u32.u64.low %v1389_v25, %v382_v14  ;;  %v1449_v23 = vmul.u32.u64.high %v1389_v25, %v382_v14, %v1448_v20  ;;  %v1452_v11 = vmul.u32.u64.low %v1389_v25, %v386_v19  ;;  %v1453_v21 = vmul.u32.u64.high %v1389_v25, %v386_v19, %v1452_v11 }
  0xf7   :  { %v961_v13 = vsel %vm1406_vm10, %v234_v38, %v649_v12  ;;  %v964_v28 = vsel %vm1406_vm10, %v546_v56, %v958_v0  ;;  %v315_v32 = vand.u32 2147483647, %v314_v17  ;;  %v317_v33 = vcvt.s32.f32 %v310_v4 }
  0xf8   :  { %v378_v36 = vsel %vm372_vm13, %v375_v41, %v377_v37  ;;  %965 = vst [vmem:[#allocation2] sm:$0xff] %v961_v13  ;;  %968 = vst [vmem:[#allocation2 + $0x18] sm:$0xff] %v964_v28  ;;  %v321_v39 = vsub.s32 4, %v1356_v54  ;;  %v397_v31 = vadd.s32 1, %v1449_v23  ;;  %vm396_vm0 = vc.u32 %v1453_v21, %v1448_v20 }
  0xf9   :  { %v318_v16 = vmul.f32 %v317_v33, %v315_v32  ;;  %v394_v18 = vmul.u32 %v1389_v25, %v378_v36  ;;  %vm237_vm1 = vcmp.lt.s32.totalorder %v1184_v49, 0  ;;  %vm236_vm2 = vcmp.le.f32.partialorder %v235_v35, 0.7853982 }
  0xfa   :  { %v398_v12 = vsel %vm396_vm0, %v397_v31, %v1449_v23  ;;  %v322_v45 = vsel %vm237_vm1, %v321_v39, %v1356_v54  ;;  %vm327_vm9 = vweird.f32 %v1184_v49  ;;  %v395_v55 = vadd.s32 %v1448_v20, %v1453_v21 }
  0xfb   :  { %v319_v38 = vxor.u32 2147483648, %v318_v16  ;;  %v399_v44 = vadd.s32 %v398_v12, %v394_v18  ;;  %v324_v60 = vsel %vm236_vm2, 0, %v322_v45  ;;  %vm341_vm12 = vcmp.lt.s32.totalorder %v1277_v8, 0 }
  0xfc   :  { %v328_v48 = vadd.s32 3, %v324_v60  ;;  %v743_v63 = vand.u32 3, %v324_v60  ;;  %vm340_vm13 = vcmp.le.f32.partialorder %v339_v7, 0.7853982 }
  0xfd   :  { %v320_v24 = vsel %vm237_vm1, %v319_v38, %v318_v16  ;;  %v400_v43 = vadd.s32 536870912, %v399_v44 }
  0xfe   :  { %v323_v58 = vsel %vm236_vm2, %v1184_v49, %v320_v24  ;;  %v329_v52 = vand.u32 3, %v328_v48  ;;  %vm745_vm4 = vcmp.eq.s32.totalorder %v743_v63, 0  ;;  %vm748_vm5 = vcmp.eq.s32.totalorder %v743_v63, 2 }
  0xff   :  { %1063 = vcosq.f32 %v323_v58  ;;  %v401_v25 = vshrl.u32 %v400_v43, 30  ;;  %vm744_vm8 = vcmp.lt.s32.totalorder %v743_v63, 2 }
 0x100   :  { %1065 = vsinq.f32 %v323_v58  ;;  %vm334_vm3 = vcmp.eq.s32.totalorder %v329_v52, 2  ;;  %vm331_vm6 = vcmp.eq.s32.totalorder %v329_v52, 0  ;;  %vm330_vm7 = vcmp.lt.s32.totalorder %v329_v52, 2 }
 0x101   :  { %v402_v47 = vshll.u32 %v401_v25, 30  ;;  %v425_v14 = vsub.s32 4, %v401_v25 }
 0x103   :  { %v403_v50 = vsub.s32 %v399_v44, %v402_v47  ;;  %v426_v19 = vsel %vm341_vm12, %v425_v14, %v401_v25 }
 0x104   :  { %v428_v23 = vsel %vm340_vm13, 0, %v426_v19 }
 0x105   :  { %v405_v51 = vsub.s32 0, %v403_v50  ;;  %v432_v11 = vadd.s32 3, %v428_v23  ;;  %v846_v13 = vand.u32 3, %v428_v23 }
 0x107   :  { %v995_v61 = vmin.u32 %v405_v51, %v403_v50  ;;  %v433_v21 = vand.u32 3, %v432_v11  ;;  %vm851_vm15 = vcmp.eq.s32.totalorder %v846_v13, 2  ;;  %vm848_vm1 = vcmp.eq.s32.totalorder %v846_v13, 0 }
 0x109   :  { %v1064_v10 = vpop.eup %1063  ;;  %v407_v3 = vclz %v995_v61  ;;  %vm438_vm14 = vcmp.eq.s32.totalorder %v433_v21, 2  ;;  %vm435_vm0 = vcmp.eq.s32.totalorder %v433_v21, 0  ;;  %vm434_vm2 = vcmp.lt.s32.totalorder %v433_v21, 2 }
 0x10a   :  { %v1066_v1 = vpop.eup %1065  ;;  %v335_v35 = vxor.u32 2147483648, %v1064_v10 }
 0x10b   :  { %v332_v26 = vxor.u32 2147483648, %v1066_v1  ;;  %v996_v30 = vadd.s32 4294967294, %v407_v3 }
 0x10c   :  { %v336_v54 = vsel %vm334_vm3, %v335_v35, %v1066_v1  ;;  %v750_v53 = vsel %vm748_vm5, %v335_v35, %v1066_v1  ;;  %vm847_vm3 = vcmp.lt.s32.totalorder %v846_v13, 2 }
 0x10d   :  { %v333_v57 = vsel %vm331_vm6, %v1064_v10, %v332_v26  ;;  %v747_v59 = vsel %vm745_vm4, %v1064_v10, %v332_v26  ;;  %vm997_vm11 = vcmp.lt.s32.totalorder %v996_v30, 0  ;;  %vm431_vm4 = vweird.f32 %v1277_v8 }
 0x10e   :  { %v337_v42 = vsel %vm330_vm7, %v333_v57, %v336_v54  ;;  %v751_v29 = vsel %vm744_vm8, %v747_v59, %v750_v53  ;;  %v410_v56 = vsel %vm997_vm11, 0, %v996_v30 }
 0x10f   :  { %v338_v34 = vsel %vm327_vm9, nan, %v337_v42  ;;  %v752_v46 = vsel %vm327_vm9, nan, %v751_v29  ;;  %v411_v62 = vsub.s32 32, %v410_v56  ;;  %v415_v0 = vsub.s32 4294967266, %v410_v56 }
 0x110   :  { %v962_v4 = vsel %vm1406_vm10, %v338_v34, %v752_v46  ;;  %v412_v2 = vshll.u32 %v403_v50, %v410_v56 }
 0x111   :  { %966 = vst [vmem:[#allocation2 + $0x8] sm:$0xff] %v962_v4  ;;  %v413_v5 = vshrl.u32 %v395_v55, %v411_v62  ;;  %v416_v6 = vadd.s32 127, %v415_v0 }
 0x113   :  { %v414_v22 = vor.u32 %v413_v5, %v412_v2  ;;  %v417_v9 = vshll.u32 %v416_v6, 23 }
 0x115   :  { %v418_v49 = vor.u32 4788187, %v417_v9  ;;  %v421_v41 = vcvt.s32.f32 %v414_v22 }
 0x117   :  { %v419_v40 = vand.u32 2147483647, %v418_v49 }
 0x119   :  { %v422_v37 = vmul.f32 %v421_v41, %v419_v40 }
 0x11b   :  { %v423_v15 = vxor.u32 2147483648, %v422_v37 }
 0x11d   :  { %v424_v17 = vsel %vm341_vm12, %v423_v15, %v422_v37 }
 0x11e   :  { %v427_v20 = vsel %vm340_vm13, %v1277_v8, %v424_v17 }
 0x11f   :  { %1067 = vcosq.f32 %v427_v20 }
 0x120   :  { %1069 = vsinq.f32 %v427_v20 }
 0x129   :  { %v1068_v28 = vpop.eup %1067 }
 0x12a   :  { %v1070_v32 = vpop.eup %1069  ;;  %v439_v33 = vxor.u32 2147483648, %v1068_v28 }
 0x12b   :  { %v436_v36 = vxor.u32 2147483648, %v1070_v32 }
 0x12c   :  { %v440_v7 = vsel %vm438_vm14, %v439_v33, %v1070_v32  ;;  %v853_v16 = vsel %vm851_vm15, %v439_v33, %v1070_v32 }
 0x12d   :  { %v437_v39 = vsel %vm435_vm0, %v1068_v28, %v436_v36  ;;  %v850_v31 = vsel %vm848_vm1, %v1068_v28, %v436_v36 }
 0x12e   :  { %v441_v18 = vsel %vm434_vm2, %v437_v39, %v440_v7  ;;  %v854_v38 = vsel %vm847_vm3, %v850_v31, %v853_v16 }
 0x12f   :  { %v442_v12 = vsel %vm431_vm4, nan, %v441_v18  ;;  %v855_v44 = vsel %vm431_vm4, nan, %v854_v38 }
 0x130   :  { %v963_v24 = vsel %vm1406_vm10, %v442_v12, %v855_v44 }
 0x131   :  { %967 = vst [vmem:[#allocation2 + $0x10] sm:$0xff] %v963_v24 }
 0x132   :  { %1082 = shalt.err (!%p1079_p4)
}
 0x133   :  { %s1083_s22 = scalar_lea.hbm %s1496_s2, 512 }
 0x134   :  { %p1084_p5 = scmp.ne.s32.totalorder %s1496_s2, %s1083_s22  ;;  %p1087_p6 = scmp.lt.u32.totalorder %s1083_s22, %s1496_s2 }
 0x136   :  { %p1089_p7 = pnand %p1087_p6, %p1084_p5 }
 0x138   :  { %1092 = shalt.err (!%p1089_p7)
}
 0x139   :  { %s1106_s27 = smov 128   ;;  %s1107_s28 = smov 8  }
 0x13a   :  { %980 = dma.vmem_to_hbm [thread:$0]  %s975_s18, 512, %s1496_s2, [#allocation3], %s1106_s27, %s1106_s27, %s1107_s28  }
 0x13b   :  { %1093 = dma.done.wait [#allocation3], 512  }
 0x13c   :  { %1094 = vsyncadd [#allocation3], 4294966784 }
 0x13d   :  { %984 = vsyncpa [#allocation3], 1 }

</bundles_post_ra>
